<compile_context>
chip_gen: v5e
topology: v5e:2x2
jax: 0.10.0
libtpu: 0.0.40
codegen_flags: <defaults>
</compile_context>

<pallas_src>
import functools

import jax
import jax.numpy as jnp
from jax.experimental import pallas as pl
from jax.experimental.pallas import tpu as pltpu


def _cosine_kernel(p_ref, z_ref, cos_ref, *, version: str):
    # One (TB, D) tile of rows; all reductions are along the lane axis (D).
    p = p_ref[...].astype(jnp.float32)              # [TB, D]
    z = z_ref[...].astype(jnp.float32)              # [TB, D]

    dot = jnp.sum(p * z, axis=-1, keepdims=True)    # [TB, 1]
    pp = jnp.sum(p * p, axis=-1, keepdims=True)     # [TB, 1]
    zz = jnp.sum(z * z, axis=-1, keepdims=True)     # [TB, 1]

    if version == "simplified":
        # F.cosine_similarity: dot / max(||p||*||z||, 1e-8).
        # max(sqrt(pp)*sqrt(zz), eps) == sqrt(max(pp*zz, eps^2)) -> one EUP rsqrt.
        eps = jnp.float32(1e-8)
        cos = dot * jax.lax.rsqrt(jnp.maximum(pp * zz, eps * eps))
    elif version == "original":
        # F.normalize(p,dim=1) . F.normalize(z,dim=1); per-vector norm clamp 1e-12.
        # max(sqrt(pp),eps)*max(sqrt(zz),eps) == sqrt(max(pp,eps^2)*max(zz,eps^2)).
        eps = jnp.float32(1e-12)
        denom_sq = jnp.maximum(pp, eps * eps) * jnp.maximum(zz, eps * eps)
        cos = dot * jax.lax.rsqrt(denom_sq)
    else:
        raise ValueError(f"unknown version: {version}")

    cos_ref[...] = cos                              # [TB, 1] per-row cosine


def _row_block(B: int, D: int, itemsize: int, block_rows=None) -> int:
    """Pick the row-tile size TB (multiple of the sublane packing for the dtype)."""
    mult = {4: 8, 2: 16, 1: 32}.get(itemsize, 8)
    b_ceil = -(-B // mult) * mult                   # B rounded up to sublane multiple
    if block_rows is None:
        # Budget ~32 MiB of input buffering: 2 inputs x 2 pipeline buffers.
        budget = 32 * 1024 * 1024
        tb = budget // (4 * D * itemsize)
        tb = (tb // mult) * mult
        tb = min(max(tb, mult), 4096)
    else:
        tb = max(mult, -(-block_rows // mult) * mult)
    return min(tb, b_ceil)


def cosine_similarity(p, z, version: str = "simplified", block_rows=None):
    """Pallas equivalent of CosineSimilarity.forward (returns a scalar)."""
    assert p.shape == z.shape and p.ndim == 2, "expected [B, D] inputs"
    if version not in ("simplified", "original"):
        raise Exception(f"unknown version: {version}")

    B, D = p.shape
    tb = _row_block(B, D, jnp.dtype(p.dtype).itemsize, block_rows)
    grid = (pl.cdiv(B, tb),)

    kernel = functools.partial(_cosine_kernel, version=version)
    cos = pl.pallas_call(
        kernel,
        out_shape=jax.ShapeDtypeStruct((B, 1), jnp.float32),
        grid=grid,
        in_specs=[
            pl.BlockSpec((tb, D), lambda i: (i, 0)),
            pl.BlockSpec((tb, D), lambda i: (i, 0)),
        ],
        out_specs=pl.BlockSpec((tb, 1), lambda i: (i, 0)),
        compiler_params=pltpu.CompilerParams(
            # Batch tiles are independent -> shard across TCs on v7x megacore.
            dimension_semantics=("parallel",),
            # Headroom above the ~32 MiB buffer budget; within v7x's 64 MiB VMEM.
            vmem_limit_bytes=48 * 1024 * 1024,
        ),
    )(p, z)

    # Tiny final reduction over B scalars done in plain JAX so the grid axis can
    # stay "parallel" (no sequential accumulator); divides by the true B.
    return jnp.mean(cos)


def negative_cosine_similarity(p, z, version: str = "simplified", block_rows=None):
    """Pallas equivalent of NegativeCosineSimilarity.forward."""
    return -cosine_similarity(p, z, version=version, block_rows=block_rows)


def _reference(p, z, version: str = "simplified"):
    p = p.astype(jnp.float32)
    z = z.astype(jnp.float32)
    if version == "simplified":
        dot = jnp.sum(p * z, axis=-1)
        denom = jnp.maximum(
            jnp.linalg.norm(p, axis=-1) * jnp.linalg.norm(z, axis=-1), 1e-8
        )
        return jnp.mean(dot / denom)
    else:
        pn = p / jnp.maximum(jnp.linalg.norm(p, axis=1, keepdims=True), 1e-12)
        zn = z / jnp.maximum(jnp.linalg.norm(z, axis=1, keepdims=True), 1e-12)
        return jnp.mean(jnp.sum(pn * zn, axis=1))


if __name__ == "__main__":
    key = jax.random.PRNGKey(0)
    kp, kz = jax.random.split(key)

    # Small SimSiam-style embedding batch.
    B, D = 8, 128
    p = jax.random.normal(kp, (B, D), dtype=jnp.float32)
    z = jax.random.normal(kz, (B, D), dtype=jnp.float32)

    out_simpl = jax.block_until_ready(cosine_similarity(p, z, "simplified"))
    out_orig = jax.block_until_ready(cosine_similarity(p, z, "original"))
    out_neg = jax.block_until_ready(negative_cosine_similarity(p, z))

    ref_simpl = _reference(p, z, "simplified")
    ref_orig = _reference(p, z, "original")
    assert jnp.allclose(out_simpl, ref_simpl, atol=1e-5, rtol=1e-5)
    assert jnp.allclose(out_orig, ref_orig, atol=1e-5, rtol=1e-5)
    assert jnp.allclose(out_neg, -ref_simpl, atol=1e-5, rtol=1e-5)

    # Multi-tile grid with a ragged last tile (B=20, block_rows=8 -> 3 tiles).
    B2, D2 = 20, 256
    p2 = jax.random.normal(kp, (B2, D2), dtype=jnp.float32)
    z2 = jax.random.normal(kz, (B2, D2), dtype=jnp.float32)
    out2 = jax.block_until_ready(
        cosine_similarity(p2, z2, "simplified", block_rows=8)
    )
    assert jnp.allclose(out2, _reference(p2, z2, "simplified"), atol=1e-5, rtol=1e-5)
    out2o = jax.block_until_ready(
        cosine_similarity(p2, z2, "original", block_rows=8)
    )
    assert jnp.allclose(out2o, _reference(p2, z2, "original"), atol=1e-5, rtol=1e-5)

    # bf16 inputs stay bf16 in HBM (half the bytes moved); f32 accumulation in-kernel.
    p3 = p2.astype(jnp.bfloat16)
    z3 = z2.astype(jnp.bfloat16)
    out3 = jax.block_until_ready(cosine_similarity(p3, z3, "simplified"))
    assert jnp.allclose(out3, _reference(p3, z3, "simplified"), atol=1e-5, rtol=1e-4)

    print("KERNEL_OK")
</pallas_src>

<mosaic_0001>
module attributes {stable_mosaic.version = 11 : i64} {
  func.func @_cosine_kernel(%arg0: i32, %arg1: memref<8x128xf32, #tpu.memory_space<vmem>>, %arg2: memref<8x128xf32, #tpu.memory_space<vmem>>, %arg3: memref<8x1xf32, #tpu.memory_space<vmem>>) attributes {dimension_semantics = [#tpu.dimension_semantics<parallel>], iteration_bounds = array<i64: 1>, scalar_prefetch = 0 : i64, scratch_operands = 0 : i64, tpu.core_type = #tpu.core_type<tc>, window_params = [{transform_indices = @transform_0, window_bounds = array<i64: 8, 128>}, {transform_indices = @transform_1, window_bounds = array<i64: 8, 128>}, {transform_indices = @transform_2, window_bounds = array<i64: 8, 1>}]} {
    %c0 = arith.constant 0 : index
    %c0_0 = arith.constant 0 : index
    %0 = vector.load %arg1[%c0, %c0_0] : memref<8x128xf32, #tpu.memory_space<vmem>>, vector<8x128xf32>
    %c0_1 = arith.constant 0 : index
    %c0_2 = arith.constant 0 : index
    %1 = vector.load %arg2[%c0_1, %c0_2] : memref<8x128xf32, #tpu.memory_space<vmem>>, vector<8x128xf32>
    %2 = arith.mulf %0, %1 : vector<8x128xf32>
    %cst = arith.constant dense<0.000000e+00> : vector<8xf32>
    %3 = vector.multi_reduction <add>, %2, %cst [1] : vector<8x128xf32> to vector<8xf32>
    %4 = vector.shape_cast %3 : vector<8xf32> to vector<8x1xf32>
    %5 = arith.mulf %0, %0 : vector<8x128xf32>
    %cst_3 = arith.constant dense<0.000000e+00> : vector<8xf32>
    %6 = vector.multi_reduction <add>, %5, %cst_3 [1] : vector<8x128xf32> to vector<8xf32>
    %7 = vector.shape_cast %6 : vector<8xf32> to vector<8x1xf32>
    %8 = arith.mulf %1, %1 : vector<8x128xf32>
    %cst_4 = arith.constant dense<0.000000e+00> : vector<8xf32>
    %9 = vector.multi_reduction <add>, %8, %cst_4 [1] : vector<8x128xf32> to vector<8xf32>
    %10 = vector.shape_cast %9 : vector<8xf32> to vector<8x1xf32>
    %11 = arith.mulf %7, %10 : vector<8x1xf32>
    %cst_5 = arith.constant 9.99999993E-9 : f32
    %cst_6 = arith.constant 9.99999993E-9 : f32
    %12 = arith.mulf %cst_5, %cst_6 : f32
    %13 = vector.broadcast %12 : f32 to vector<8x1xf32>
    %14 = arith.maximumf %11, %13 : vector<8x1xf32>
    %15 = math.rsqrt %14 : vector<8x1xf32>
    %16 = arith.mulf %4, %15 : vector<8x1xf32>
    %c0_7 = arith.constant 0 : index
    %c0_8 = arith.constant 0 : index
    %17 = vector.load %arg3[%c0_7, %c0_8] : memref<8x1xf32, #tpu.memory_space<vmem>>, vector<8x1xf32>
    tpu.vector_store %arg3[%c0_7, %c0_8], %16 {strides = array<i32>} : memref<8x1xf32, #tpu.memory_space<vmem>>, vector<8x1xf32>,
    return
  }
  func.func @transform_0(%arg0: i32) -> (i32, i32) {
    %c0_i32 = arith.constant 0 : i32
    %c0_i32_0 = arith.constant 0 : i32
    return %arg0, %c0_i32 : i32, i32
  }
  func.func @transform_1(%arg0: i32) -> (i32, i32) {
    %c0_i32 = arith.constant 0 : i32
    %c0_i32_0 = arith.constant 0 : i32
    return %arg0, %c0_i32 : i32, i32
  }
  func.func @transform_2(%arg0: i32) -> (i32, i32) {
    %c0_i32 = arith.constant 0 : i32
    %c0_i32_0 = arith.constant 0 : i32
    return %arg0, %c0_i32 : i32, i32
  }
}

</mosaic_0001>

<bundles_post_ra>
// kernel: tpu_custom_call.1
= control target key start
LH: loop header
LB: loop body
LE: loop exit
PB: predicated region body
PF: predicated region fallthrough
CT: control target
= control target key end

     0   :  { %7 = vsyncpa [#allocation3], 0  ;;  %s153_s0 = inlined_call_operand.hbm [shape: f32[8,128], index: 0, kind: input, shape index: {}]   ;;  %s154_s1 = inlined_call_operand.hbm [shape: f32[8,128], index: 1, kind: input, shape index: {}]   ;;  %s155_s2 = inlined_call_operand.vmem [shape: f32[8,1], index: 2, kind: output, shape index: {}]  }
   0x1   :  { %s14_s11 = sshll.u32 %s153_s0, 4  ;;  %s15_s11 = int_to_ptr.hbm [resolvable:$true] %s14_s11 }
   0x2   :  { %8 = vsyncpa [#allocation5], 0  ;;  %s127_s12 = smov [#allocation2]   ;;  %s25_s16 = sshll.u32 %s154_s1, 4  ;;  %s26_s16 = int_to_ptr.hbm [resolvable:$true] %s25_s16 }
   0x3   :  { %s16_s13 = sshll.u32 %s127_s12, 4  ;;  %s128_s17 = smov [#allocation4]   ;;  %s17_s13 = int_to_ptr.vmem [resolvable:$true] %s16_s13 }
   0x4   :  { %19 = dma.hbm_to_vmem [thread:$0]  %s15_s11, 128, %s17_s13, [#allocation3]  }
   0x5   :  { %s27_s18 = sshll.u32 %s128_s17, 4  ;;  %s28_s18 = int_to_ptr.vmem [resolvable:$true] %s27_s18 }
   0x6   :  { %30 = dma.hbm_to_vmem [thread:$0]  %s26_s16, 128, %s28_s18, [#allocation5]  }
   0x7   :  { %123 = dma.done.wait [#allocation3], 128  }
   0x8   :  { %124 = vsyncadd [#allocation3], 4294967168 }
   0x9   :  { %125 = dma.done.wait [#allocation5], 128  }
   0xa   :  { %126 = vsyncadd [#allocation5], 4294967168  ;;  %v39_v0 = vld [vmem:[#allocation2] sm:$0xff]  ;;  %v40_v1 = vld [vmem:[#allocation4] sm:$0xff]  ;;  %vm63_vm3 = vcmask 7168  }
   0xb   :  { %v44_v2 = vmul.f32 %v39_v0, %v39_v0  ;;  %v41_v3 = vmul.f32 %v40_v1, %v39_v0  ;;  %v47_v4 = vmul.f32 %v40_v1, %v40_v1 }
   0xd   :  { %45 = vadd.xlane.f32.xlu0 %v44_v2  ;;  %42 = vadd.xlane.f32.xlu1 %v41_v3 }
  0x15   :  { %48 = vadd.xlane.f32.xlu0 %v47_v4 }
  0x80   :  { %v46_v5 = vpop.xlane.xlu0 %45  ;;  %v43_v15 = vpop.xlane.xlu1 %42 }
  0x88   :  { %v49_v6 = vpop.xlane.xlu0 %48 }
  0x89   :  { %v50_v7 = vmul.f32 %v49_v6, %v46_v5 }
  0x8b   :  { %v51_v8 = vmax.f32 %v50_v7, 1e-16 }
  0x8d   :  { %73 = vrsqrt.f32 %v51_v8  ;;  %vm58_vm1 = vweird.f32 %v51_v8 }
  0x93   :  { %v74_v9 = vpop.eup %73 }
  0x94   :  { %v53_v10 = vmul.f32 %v74_v9, %v51_v8  ;;  %vm59_vm0 = vweird.f32 %v74_v9 }
  0x95   :  { %vm60_vm2 = vmor %vm58_vm1, %vm59_vm0 }
  0x96   :  { %v54_v11 = vmul.f32 %v74_v9, %v53_v10 }
  0x98   :  { %v55_v12 = vmul.f32 0.5, %v54_v11 }
  0x9a   :  { %v56_v13 = vsub.f32 1.5, %v55_v12 }
  0x9c   :  { %v57_v14 = vmul.f32 %v74_v9, %v56_v13 }
  0x9e   :  { %v61_v16 = vsel %vm60_vm2, %v74_v9, %v57_v14 }
  0x9f   :  { %v62_v17 = vmul.f32 %v61_v16, %v43_v15 }
  0xa1   :  { %64 = vst.msk [vmem:[%s155_s2] sm:$0xff] %vm63_vm3, %v62_v17 }
  0xa2   :  { %69 = vsyncpa [#allocation3], 1 }
  0xa3   :  { %70 = vsyncpa [#allocation5], 1 }

</bundles_post_ra>
